<compile_context>
chip_gen: v6e
topology: v6e:2x2x1
jax: 0.10.0
libtpu: 0.0.40
codegen_flags: <defaults>
</compile_context>

<pallas_src>
import functools

import numpy as np
import jax
import jax.numpy as jnp
from jax.experimental import pallas as pl
from jax.experimental.pallas import tpu as pltpu

W_COEFF = 2.5
EPS = 1e-6

# Per-tile budget in *padded* f32 elements.  Worst-case VMEM footprint is about
# 2 (double-buffered input) + ~6 (f32 roll / diff / product temporaries) tile
# sized buffers, so 384K elems (1.5 MiB) keeps the kernel around ~13 MiB --
# under the 16 MiB scoped-VMEM default on v5e (v6e / v7x default to 32 MiB).
_MAX_TILE_ELEMS = 384 * 1024
# Do not split into multiple tiles unless every tile keeps at least this many
# elements (the ~0.35 us per grid step has to stay amortised).
_MIN_TILE_ELEMS = 64 * 1024
_VMEM_LIMIT_BYTES = 32 * 1024 * 1024


def _round_up(x, m):
    return -(-x // m) * m


def _tv_tile_kernel(x_ref, cmask_ref, valid_ref, seam_ref, o_ref, *, width):
    """Partial TV of one (tb, L) tile of the packed patch.

    Packed layout: sublane-row `s` holds R = L // width consecutive image rows
    of one channel, flattened along lanes.  All neighbour accesses are XLU
    rolls; validity is applied via precomputed mask multiplies (no iota/mod).
    """
    x = x_ref[...].astype(jnp.float32)                     # (tb, L)
    tb, lanes = x.shape

    nxt_w = pltpu.roll(x, shift=lanes - 1, axis=1)         # x[s, (j+1) % L]
    nxt_h = pltpu.roll(x, shift=lanes - width, axis=1)     # x[s, (j+W) % L]
    nxt_hs = pltpu.roll(nxt_h, shift=tb - 1, axis=0)       # x[(s+1)%tb, (j+W) % L]

    m_w = cmask_ref[0:1, :]    # (1, L): j % W != W-1   (W-diff valid)
    m_hi = cmask_ref[1:2, :]   # (1, L): j <  L - W     (in-row H-diff valid)
    m_hl = cmask_ref[2:3, :]   # (1, L): j >= L - W     (last image row of the sublane-row)
    valid = valid_ref[...]     # (tb, 1): 1 on real rows, 0 on sublane padding
    seam = seam_ref[...]       # (tb, 1): 1 where the row below is the in-tile H-successor

    d_in = (jnp.abs(nxt_w - x + EPS) * m_w +
            jnp.abs(nxt_h - x + EPS) * m_hi) * valid
    d_seam = jnp.abs(nxt_hs - x + EPS) * m_hl * seam
    part = jnp.sum(d_in + d_seam)

    # Full-block, lane-dense store of the per-tile partial sum.
    o_ref[...] = jnp.full(o_ref.shape, part, dtype=jnp.float32)


def _choose_pack(c, h, w):
    """Pick R = image rows folded into each sublane-row (must divide H),
    minimizing the (8,128)-padded footprint; ties go to the lane-denser R."""
    best_key, best_r = None, 1
    for r in range(1, h + 1):
        if h % r:
            continue
        lanes = r * w
        lanes_pad = _round_up(lanes, 128)
        if 8 * lanes_pad > _MAX_TILE_ELEMS:      # a minimal 8-row tile must fit VMEM
            continue
        s = c * (h // r)
        s_pad = _round_up(s, 8)
        key = (s_pad * lanes_pad / float(c * h * w), -lanes)
        if best_key is None or key < best_key:
            best_key, best_r = key, r
    return best_r


def _choose_tile(s_pad, lanes_pad, rows_per_chan, real_elems, forced=None):
    """Tile height in packed sublane-rows.  Prefers channel-aligned tiles (no
    cross-tile seams) and >=2 tiles for big patches (v7x megacore sharding)."""
    if forced is not None:
        tb = int(forced)
        assert s_pad % tb == 0 and (tb % 8 == 0 or tb == s_pad), (
            "tile_rows must divide the padded sublane count and be a multiple of 8")
        return tb
    divs = [tb for tb in range(8, s_pad + 1, 8) if s_pad % tb == 0]
    fit = [tb for tb in divs if tb * lanes_pad <= _MAX_TILE_ELEMS] or [divs[0]]
    aligned = [tb for tb in fit if tb % rows_per_chan == 0 or tb == s_pad]
    cands = aligned or fit

    if real_elems >= 2 * _MIN_TILE_ELEMS:
        multi = [tb for tb in cands if tb < s_pad and tb * lanes_pad >= _MIN_TILE_ELEMS]
        if multi:
            return max(multi)
    return max(cands)


def total_variation(adv_patch: jax.Array, w: float = W_COEFF, *,
                    rows_per_subrow=None, tile_rows=None) -> jax.Array:
    """Pallas TV loss of a (C, H, W) patch.  Returns a float32 scalar.

    `rows_per_subrow` / `tile_rows` are testing overrides for the packing
    factor R and the per-tile sublane-row count.
    """
    assert adv_patch.ndim == 3, "expected a (C, H, W) patch"
    c, h, wd = adv_patch.shape
    numel = c * h * wd

    r = int(rows_per_subrow) if rows_per_subrow is not None else _choose_pack(c, h, wd)
    assert h % r == 0, "rows_per_subrow must divide H"
    rows_per_chan = h // r
    lanes = r * wd
    lanes_pad = _round_up(lanes, 128)
    s = c * rows_per_chan
    s_pad = _round_up(s, 8)

    tb = _choose_tile(s_pad, lanes_pad, rows_per_chan, numel, tile_rows)
    num_tiles = s_pad // tb

    # ---- layout plumbing: pure reshape; rows are zero-padded only if S%8 != 0.
    x2 = adv_patch.reshape(s, lanes)
    if s_pad != s:
        x2 = jnp.pad(x2, ((0, s_pad - s), (0, 0)))

    # ---- tiny precomputed masks (compile-time constants; no in-kernel iota).
    j = np.arange(lanes)
    col_masks = np.stack([
        (j % wd != wd - 1),        # W-diff valid
        (j < lanes - wd),          # in-row H-diff valid
        (j >= lanes - wd),         # last image row of each sublane-row
    ]).astype(np.float32)                                       # (3, L)

    g = np.arange(s_pad)
    blk = g % rows_per_chan
    valid_rows = (g < s).astype(np.float32).reshape(-1, 1)      # (S_pad, 1)
    seam_rows = ((g < s)
                 & (blk != rows_per_chan - 1)                   # not the channel's last row
                 & ((g + 1) % tb != 0)                          # successor row is in the same tile
                 ).astype(np.float32).reshape(-1, 1)            # (S_pad, 1)

    kernel = functools.partial(_tv_tile_kernel, width=wd)
    partials = pl.pallas_call(
        kernel,
        out_shape=jax.ShapeDtypeStruct((num_tiles, 8, 128), jnp.float32),
        grid=(num_tiles,),
        in_specs=[
            pl.BlockSpec((tb, lanes), lambda i: (i, 0)),
            pl.BlockSpec((3, lanes), lambda i: (0, 0)),   # fetched once, stays VMEM-resident
            pl.BlockSpec((tb, 1), lambda i: (i, 0)),
            pl.BlockSpec((tb, 1), lambda i: (i, 0)),
        ],
        out_specs=pl.BlockSpec((1, 8, 128), lambda i: (i, 0, 0)),
        compiler_params=pltpu.CompilerParams(
            dimension_semantics=("parallel",),
            vmem_limit_bytes=_VMEM_LIMIT_BYTES),
        cost_estimate=pl.CostEstimate(
            flops=16 * s_pad * lanes_pad,
            transcendentals=0,
            bytes_accessed=4 * (s_pad * lanes + 3 * lanes + 2 * s_pad
                                + num_tiles * 8 * 128)),
    )(x2, jnp.asarray(col_masks), jnp.asarray(valid_rows), jnp.asarray(seam_rows))

    total = jnp.sum(partials[:, 0, 0])

    # H-diffs cut by an *unaligned* tile boundary.  With the default tiling the
    # boundaries coincide with channel boundaries and this list is empty; it is
    # only non-empty when a single channel is too large for the VMEM budget.
    seam_c, seam_h = [], []
    for gg in range(s):
        bb = gg % rows_per_chan
        if bb == rows_per_chan - 1 or (gg + 1) % tb != 0:
            continue
        seam_c.append(gg // rows_per_chan)
        seam_h.append((bb + 1) * r - 1)
    if seam_c:
        cs = jnp.asarray(seam_c)
        hs = jnp.asarray(seam_h)
        lo = adv_patch[cs, hs, :].astype(jnp.float32)
        hi = adv_patch[cs, hs + 1, :].astype(jnp.float32)
        total = total + jnp.sum(jnp.abs(hi - lo + EPS))

    return total / jnp.float32(numel) * jnp.float32(w)


def _total_variation_ref(x: jax.Array, w: float = W_COEFF) -> jax.Array:
    x = x.astype(jnp.float32)
    tv1 = jnp.sum(jnp.abs(x[:, :, 1:] - x[:, :, :-1] + EPS))
    tv2 = jnp.sum(jnp.abs(x[:, 1:, :] - x[:, :-1, :] + EPS))
    return (tv1 + tv2) / x.size * w


if __name__ == "__main__":
    key = jax.random.PRNGKey(0)
    keys = jax.random.split(key, 4)

    cases = [
        # shape            kwargs                         exercised path
        ((3, 16, 16), {}),                                 # S=6 -> padded to 8 sublanes, single tile
        ((3, 32, 32), {}),                                 # unpadded S=24, single tile
        ((3, 64, 128), dict(tile_rows=8)),                 # 3 channel-aligned tiles ("parallel" grid)
        ((3, 64, 128), dict(rows_per_subrow=4, tile_rows=8)),  # unaligned tiles + wrapper seam fallback
    ]
    for k, (shape, kwargs) in zip(keys, cases):
        patch = jax.random.uniform(k, shape, dtype=jnp.float32)
        out = total_variation(patch, **kwargs)
        jax.block_until_ready(out)
        ref = _total_variation_ref(patch)
        assert jnp.allclose(out, ref, rtol=2e-5, atol=1e-5), (shape, kwargs, out, ref)

    print("KERNEL_OK")
</pallas_src>

<mosaic_0001>
module attributes {stable_mosaic.version = 11 : i64} {
  func.func @_tv_tile_kernel(%arg0: i32, %arg1: memref<8x128xf32, #tpu.memory_space<vmem>>, %arg2: memref<3x128xf32, #tpu.memory_space<vmem>>, %arg3: memref<8x1xf32, #tpu.memory_space<vmem>>, %arg4: memref<8x1xf32, #tpu.memory_space<vmem>>, %arg5: memref<1x8x128xf32, #tpu.memory_space<vmem>>) attributes {dimension_semantics = [#tpu.dimension_semantics<parallel>], iteration_bounds = array<i64: 1>, scalar_prefetch = 0 : i64, scratch_operands = 0 : i64, tpu.core_type = #tpu.core_type<tc>, window_params = [{transform_indices = @transform_0, window_bounds = array<i64: 8, 128>}, {pipeline_mode = #tpu.pipeline_mode<synchronous>, transform_indices = @transform_1, window_bounds = array<i64: 3, 128>}, {transform_indices = @transform_2, window_bounds = array<i64: 8, 1>}, {transform_indices = @transform_3, window_bounds = array<i64: 8, 1>}, {transform_indices = @transform_4, window_bounds = array<i64: 1, 8, 128>}]} {
    %c0 = arith.constant 0 : index
    %c0_0 = arith.constant 0 : index
    %0 = vector.load %arg1[%c0, %c0_0] : memref<8x128xf32, #tpu.memory_space<vmem>>, vector<8x128xf32>
    %c127_i32 = arith.constant 127 : i32
    %1 = tpu.dynamic_rotate %0 by %c127_i32 dim 1 : vector<8x128xf32>, i32 -> vector<8x128xf32>
    %c112_i32 = arith.constant 112 : i32
    %2 = tpu.dynamic_rotate %0 by %c112_i32 dim 1 : vector<8x128xf32>, i32 -> vector<8x128xf32>
    %c7_i32 = arith.constant 7 : i32
    %3 = tpu.dynamic_rotate %2 by %c7_i32 dim 0 : vector<8x128xf32>, i32 -> vector<8x128xf32>
    %c0_1 = arith.constant 0 : index
    %c0_2 = arith.constant 0 : index
    %4 = vector.load %arg2[%c0_1, %c0_2] : memref<3x128xf32, #tpu.memory_space<vmem>>, vector<1x128xf32>
    %c1 = arith.constant 1 : index
    %c0_3 = arith.constant 0 : index
    %5 = vector.load %arg2[%c1, %c0_3] : memref<3x128xf32, #tpu.memory_space<vmem>>, vector<1x128xf32>
    %c2 = arith.constant 2 : index
    %c0_4 = arith.constant 0 : index
    %6 = vector.load %arg2[%c2, %c0_4] : memref<3x128xf32, #tpu.memory_space<vmem>>, vector<1x128xf32>
    %c0_5 = arith.constant 0 : index
    %c0_6 = arith.constant 0 : index
    %7 = vector.load %arg3[%c0_5, %c0_6] : memref<8x1xf32, #tpu.memory_space<vmem>>, vector<8x1xf32>
    %c0_7 = arith.constant 0 : index
    %c0_8 = arith.constant 0 : index
    %8 = vector.load %arg4[%c0_7, %c0_8] : memref<8x1xf32, #tpu.memory_space<vmem>>, vector<8x1xf32>
    %9 = arith.subf %1, %0 : vector<8x128xf32>
    %cst = arith.constant 9.99999997E-7 : f32
    %10 = vector.broadcast %cst : f32 to vector<8x128xf32>
    %11 = arith.addf %9, %10 : vector<8x128xf32>
    %12 = math.absf %11 : vector<8x128xf32>
    %13 = vector.broadcast %4 : vector<1x128xf32> to vector<8x128xf32>
    %14 = arith.mulf %12, %13 : vector<8x128xf32>
    %15 = arith.subf %2, %0 : vector<8x128xf32>
    %cst_9 = arith.constant 9.99999997E-7 : f32
    %16 = vector.broadcast %cst_9 : f32 to vector<8x128xf32>
    %17 = arith.addf %15, %16 : vector<8x128xf32>
    %18 = math.absf %17 : vector<8x128xf32>
    %19 = vector.broadcast %5 : vector<1x128xf32> to vector<8x128xf32>
    %20 = arith.mulf %18, %19 : vector<8x128xf32>
    %21 = arith.addf %14, %20 : vector<8x128xf32>
    %22 = vector.broadcast %7 : vector<8x1xf32> to vector<8x128xf32>
    %23 = arith.mulf %21, %22 : vector<8x128xf32>
    %24 = arith.subf %3, %0 : vector<8x128xf32>
    %cst_10 = arith.constant 9.99999997E-7 : f32
    %25 = vector.broadcast %cst_10 : f32 to vector<8x128xf32>
    %26 = arith.addf %24, %25 : vector<8x128xf32>
    %27 = math.absf %26 : vector<8x128xf32>
    %28 = vector.broadcast %6 : vector<1x128xf32> to vector<8x128xf32>
    %29 = arith.mulf %27, %28 : vector<8x128xf32>
    %30 = vector.broadcast %8 : vector<8x1xf32> to vector<8x128xf32>
    %31 = arith.mulf %29, %30 : vector<8x128xf32>
    %32 = arith.addf %23, %31 : vector<8x128xf32>
    %33 = vector.shape_cast %32 : vector<8x128xf32> to vector<1x8x128xf32>
    %cst_11 = arith.constant dense<0.000000e+00> : vector<1xf32>
    %34 = vector.multi_reduction <add>, %33, %cst_11 [1, 2] : vector<1x8x128xf32> to vector<1xf32>
    %35 = vector.shape_cast %34 : vector<1xf32> to vector<1x1x1xf32>
    %36 = vector.extract %35[0, 0, 0] : f32 from vector<1x1x1xf32>
    %37 = vector.broadcast %36 : f32 to vector<1x8x128xf32>
    %c0_12 = arith.constant 0 : index
    %c0_13 = arith.constant 0 : index
    %c0_14 = arith.constant 0 : index
    %38 = vector.load %arg5[%c0_12, %c0_13, %c0_14] : memref<1x8x128xf32, #tpu.memory_space<vmem>>, vector<1x8x128xf32>
    tpu.vector_store %arg5[%c0_12, %c0_13, %c0_14], %37 {strides = array<i32>} : memref<1x8x128xf32, #tpu.memory_space<vmem>>, vector<1x8x128xf32>,
    return
  }
  func.func @transform_0(%arg0: i32) -> (i32, i32) {
    %c0_i32 = arith.constant 0 : i32
    %c0_i32_0 = arith.constant 0 : i32
    return %arg0, %c0_i32 : i32, i32
  }
  func.func @transform_1(%arg0: i32) -> (i32, i32) {
    %c0_i32 = arith.constant 0 : i32
    %c0_i32_0 = arith.constant 0 : i32
    %c0_i32_1 = arith.constant 0 : i32
    return %c0_i32, %c0_i32_0 : i32, i32
  }
  func.func @transform_2(%arg0: i32) -> (i32, i32) {
    %c0_i32 = arith.constant 0 : i32
    %c0_i32_0 = arith.constant 0 : i32
    return %arg0, %c0_i32 : i32, i32
  }
  func.func @transform_3(%arg0: i32) -> (i32, i32) {
    %c0_i32 = arith.constant 0 : i32
    %c0_i32_0 = arith.constant 0 : i32
    return %arg0, %c0_i32 : i32, i32
  }
  func.func @transform_4(%arg0: i32) -> (i32, i32, i32) {
    %c0_i32 = arith.constant 0 : i32
    %c0_i32_0 = arith.constant 0 : i32
    %c0_i32_1 = arith.constant 0 : i32
    return %arg0, %c0_i32, %c0_i32_0 : i32, i32, i32
  }
}

</mosaic_0001>

<bundles_post_ra>
// kernel: tpu_custom_call.1
= control target key start
LH: loop header
LB: loop body
LE: loop exit
PB: predicated region body
PF: predicated region fallthrough
CT: control target
= control target key end

     0   :  { %v125_v2 = vmov 0   ;;  %s126_s19 = smov 127   ;;  %s175_s0 = inlined_call_operand.vmem [shape: f32[8,128], index: 0, kind: input, shape index: {}]   ;;  %s176_s1 = inlined_call_operand.vmem [shape: f32[3,128], index: 1, kind: input, shape index: {}]   ;;  %s177_s2 = inlined_call_operand.vmem [shape: f32[8,1], index: 2, kind: input, shape index: {}]   ;;  %s178_s3 = inlined_call_operand.vmem [shape: f32[8,1], index: 3, kind: input, shape index: {}]   ;;  %s179_s4 = inlined_call_operand.hbm [shape: f32[1,8,128], index: 4, kind: output, shape index: {}]  }
   0x1   :  { %v18_v0 = vld [vmem:[%s175_s0] sm:$0xff]  ;;  %101 = vset.pattern.permute.xlu1 %v125_v2  ;;  %102 = vset.pattern.permute.xlu0 %v125_v2 }
   0x2   :  { %v27_v1 = vld [vmem:[%s177_s2] sm:$0xff]  ;;  %19 = vrot.lane.b32.xlu0 %v18_v0, %s126_s19 }
   0x3   :  { %48 = vperm.xlu1 %101, %v27_v1  }
   0x4   :  { %9 = vsyncpa [#allocation3], 0  ;;  %v28_v3 = vld [vmem:[%s178_s3] sm:$0xff]  ;;  %s127_s22 = smov 112   ;;  %s128_s26 = smov [#allocation2]  }
   0x5   :  { %v92_v13 = vld [vmem:[%s176_s1] ss:$0 sm:$0xff]  ;;  %v93_v14 = vld [vmem:[%s176_s1 + $0x1] ss:$0 sm:$0xff]  ;;  %v94_v18 = vld [vmem:[%s176_s1 + $0x2] ss:$0 sm:$0xff] }
   0x6   :  { %21 = vrot.lane.b32.xlu0 %v18_v0, %s127_s22  ;;  %s84_s1 = sshll.u32 %s128_s26, 4  ;;  %s85_s1 = int_to_ptr.vmem [resolvable:$true] %s84_s1 }
   0x7   :  { %62 = vperm.xlu1 %101, %v28_v3   ;;  %s103_s28 = scalar_lea.vmem %s85_s1, 128  ;;  %p108_p1 = scmp.lt.s32.totalorder %s85_s1, %s85_s1 }
   0x8   :  { %p104_p0 = scmp.ne.s32.totalorder %s85_s1, %s103_s28  ;;  %p109_p2 = scmp.lt.s32.totalorder %s103_s28, %s103_s28 }
   0xa   :  { %p110_p3 = por %p109_p2, %p108_p1 }
   0xc   :  { %p111_p4 = pnand %p110_p3, %p104_p0 }
  0x74   :  { %v20_v4 = vpop.permute.xlu0 %19 }
  0x75   :  { %v29_v5 = vsub.f32 %v20_v4, %v18_v0 }
  0x77   :  { %v30_v6 = vadd.f32 1e-06, %v29_v5 }
  0x78   :  { %v22_v7 = vpop.permute.xlu0 %21 }
  0x79   :  { %v23_v8 = vrot.slane %v22_v7, 1  ;;  %v37_v9 = vsub.f32 %v22_v7, %v18_v0  ;;  %v31_v10 = vand.u32 2147483647, %v30_v6 }
  0x7b   :  { %v38_v11 = vadd.f32 1e-06, %v37_v9  ;;  %v52_v12 = vsub.f32 %v23_v8, %v18_v0  ;;  %v36_v19 = vmul.f32 %v92_v13, %v31_v10 }
  0x7d   :  { %v39_v15 = vand.u32 2147483647, %v38_v11  ;;  %v53_v16 = vadd.f32 1e-06, %v52_v12 }
  0x7e   :  { %v49_v17 = vpop.permute.xlu1 %48 }
  0x7f   :  { %v44_v20 = vmul.f32 %v93_v14, %v39_v15  ;;  %v54_v21 = vand.u32 2147483647, %v53_v16 }
  0x81   :  { %v45_v22 = vadd.f32 %v44_v20, %v36_v19  ;;  %v59_v23 = vmul.f32 %v94_v18, %v54_v21 }
  0x82   :  { %v63_v24 = vpop.permute.xlu1 %62 }
  0x83   :  { %v51_v25 = vmul.f32 %v49_v17, %v45_v22  ;;  %v65_v26 = vmul.f32 %v63_v24, %v59_v23 }
  0x85   :  { %v66_v27 = vadd.f32 %v65_v26, %v51_v25 }
  0x87   :  { %67 = vadd.xlane.f32.xlu0 %v66_v27 }
 0x110   :  { %v68_v28 = vpop.xlane.xlu0 %67 }
 0x111   :  { %v69_v29 = vrot.slane %v68_v28, 4 }
 0x113   :  { %v70_v30 = vadd.f32 %v69_v29, %v68_v28 }
 0x115   :  { %v71_v31 = vrot.slane %v70_v30, 2 }
 0x117   :  { %v72_v32 = vadd.f32 %v71_v31, %v70_v30 }
 0x119   :  { %v73_v33 = vrot.slane %v72_v32, 1 }
 0x11b   :  { %v74_v34 = vadd.f32 %v73_v33, %v72_v32 }
 0x11d   :  { %95 = vpush %v74_v34 }
 0x14e   :  { %s96_s27 = spop %95 }
 0x14f   :  { %v76_v35 = vstv %s96_s27 }
 0x150   :  { %77 = vst [vmem:[#allocation2] sm:$0xff] %v76_v35 }
 0x151   :  { %114 = shalt.err (!%p111_p4)
}
 0x152   :  { %87 = dma.vmem_to_hbm [thread:$0]  %s85_s1, 128, %s179_s4, [#allocation3]  }
 0x153   :  { %123 = dma.done.wait [#allocation3], 128  }
 0x154   :  { %124 = vsyncadd [#allocation3], 4294967168 }
 0x155   :  { %91 = vsyncpa [#allocation3], 1 }

</bundles_post_ra>
